<compile_context>
chip_gen: v7x
topology: tpu7x:2x2x1
jax: 0.10.0
libtpu: 0.0.40
codegen_flags: <defaults>
</compile_context>

<pallas_src>
import jax
import jax.numpy as jnp
from jax import lax
from jax.experimental import pallas as pl
from jax.experimental.pallas import tpu as pltpu

_TINY = 1e-30
_LANES = 128


def _round_up(x, m):
    return ((x + m - 1) // m) * m


def _vmem_capacity_bytes():
    try:
        return int(pltpu.get_tpu_info().vmem_capacity_bytes)
    except Exception:
        return 64 * 1024 * 1024


# --------------------------- Pallas kernel ----------------------------------
def _crf_denom_kernel(em_ref, mask_ref, p0_ref, c0_ref, etrans_ref, eend_ref,
                      out_ref, p_scr, c_scr):
    """Forward-algorithm (log-partition) recursion for one (batch-tile, T-chunk)."""
    t = pl.program_id(1)
    nt = pl.num_programs(1)
    tc = em_ref.shape[0]
    tiny = jnp.float32(_TINY)

    # First T-chunk: load the wrapper-peeled timestep-0 state into scratch.
    @pl.when(t == 0)
    def _():
        p_scr[...] = p0_ref[...]
        c_scr[...] = c0_ref[...]

    etrans = etrans_ref[...]                                   # (K_sub, K_sub)

    def body(i, carry):
        p, c = carry                                           # (K_sub,TB), (1,TB)
        em_i = em_ref[i]                                       # (K_sub, TB)
        keep = mask_ref[i] > 0.0                               # (1, TB)

        m_e = jnp.max(em_i, axis=0, keepdims=True)             # (1, TB)
        e = jnp.exp(em_i - m_e)                                # (K_sub, TB)
        s = jnp.dot(etrans, p, preferred_element_type=jnp.float32)
        u = s * e
        norm = jnp.maximum(jnp.sum(u, axis=0, keepdims=True), tiny)
        p_new = u * (1.0 / norm)                               # exact reciprocal
        c_new = c + jnp.log(norm) + m_e

        p = jnp.where(keep, p_new, p)
        c = jnp.where(keep, c_new, c)
        return p, c

    p, c = lax.fori_loop(0, tc, body, (p_scr[...], c_scr[...]))
    p_scr[...] = p
    c_scr[...] = c

    # Last T-chunk: fold in end transitions and emit the (shifted) log-partition.
    @pl.when(t == nt - 1)
    def _():
        z = jnp.sum(p * eend_ref[...], axis=0, keepdims=True)  # (1, TB)
        out_ref[...] = c + jnp.log(jnp.maximum(z, tiny))


# ------------------------------ wrapper --------------------------------------
def _crf_numerator(emissions, tags, mask_f, start_t, end_t, trans):
    """Gold-path score, plain JAX gathers (O(T*B))."""
    T, B, _ = emissions.shape
    b_idx = jnp.arange(B)
    em_tag = jnp.take_along_axis(emissions, tags[..., None], axis=2)[..., 0]  # (T,B)
    score = start_t[tags[0]] + em_tag[0]
    trans_step = trans[tags[:-1], tags[1:]]                                   # (T-1,B)
    score = score + jnp.sum((trans_step + em_tag[1:]) * mask_f[1:], axis=0)
    seq_ends = jnp.sum(mask_f, axis=0).astype(jnp.int32) - 1
    last_tags = tags[seq_ends, b_idx]
    return score + end_t[last_tags]


def _crf_denominator(emissions, mask_f, start_t, end_t, trans, t_chunk=None):
    """Log-partition per batch element via the Pallas forward recursion."""
    T, B, K = emissions.shape
    K_sub = _round_up(K, 8)
    TB = _LANES
    B_pad = _round_up(B, TB)
    nb = B_pad // TB
    # TODO(synk): on v7x (2 TensorCores) pick the batch tiling so nb >= 2 even
    # for small B, otherwise one core idles on the 'parallel' axis.

    # --- timestep 0 peeled in the wrapper: alpha0 = start + em0 -> (p0, c0) ---
    a0 = start_t[None, :] + emissions[0]                       # (B, K)
    m0 = jnp.max(a0, axis=1, keepdims=True)
    u0 = jnp.exp(a0 - m0)
    n0 = jnp.sum(u0, axis=1, keepdims=True)
    p0 = u0 / n0                                               # (B, K), rows sum to 1
    c0 = (m0 + jnp.log(n0))[:, 0]                              # (B,)

    # --- overflow-safe exp of the (tiny) transition / end parameters ---
    c_t = jnp.max(trans)
    etrans_T = jnp.zeros((K_sub, K_sub), jnp.float32).at[:K, :K].set(
        jnp.exp(trans.T - c_t))                                # [j,k] = exp(trans[k,j]-c_t)
    end_max = jnp.max(end_t)
    eend = jnp.zeros((K_sub, 1), jnp.float32).at[:K, 0].set(jnp.exp(end_t - end_max))

    # --- remaining timesteps, batch-in-lanes layout (T, K_sub, B_pad) ---
    t_rest = max(T - 1, 0)
    vmem_cap = _vmem_capacity_bytes()
    if t_chunk is None:
        blk_budget = min(vmem_cap // 6, 16 * 1024 * 1024)
        per_step = 2 * (K_sub + 1) * TB * 4                    # dbl-buffered em + mask
        t_chunk = max(8, min(_round_up(max(t_rest, 1), 8),
                             (blk_budget // per_step) // 8 * 8))
    t_chunk = max(8, _round_up(int(t_chunk), 8))
    T_pad = _round_up(max(t_rest, 1), t_chunk)
    nt = T_pad // t_chunk

    em_rest = jnp.transpose(emissions[1:], (0, 2, 1))          # (t_rest, K, B)
    em_p = jnp.zeros((T_pad, K_sub, B_pad), jnp.float32).at[
        :t_rest, :K, :B].set(em_rest)
    mask_p = jnp.zeros((T_pad, 1, B_pad), jnp.float32).at[
        :t_rest, 0, :B].set(mask_f[1:])
    p0_p = jnp.zeros((K_sub, B_pad), jnp.float32).at[:K, :B].set(p0.T)
    c0_p = jnp.zeros((1, B_pad), jnp.float32).at[0, :B].set(c0)

    needed = 2 * t_chunk * (K_sub + 1) * TB * 4 + (2 << 20)
    vmem_limit = int(min(vmem_cap * 3 // 4,
                         max(32 * 1024 * 1024, needed + (8 << 20))))

    cost = pl.CostEstimate(
        flops=int(2 * nb * nt * t_chunk * K_sub * K_sub * TB),
        transcendentals=int(nb * nt * t_chunk * (K_sub + 2) * TB),
        bytes_accessed=int(em_p.size * 4 + mask_p.size * 4 + p0_p.size * 4 +
                           c0_p.size * 4 + etrans_T.size * 4 + nb * TB * 4),
    )

    out = pl.pallas_call(
        _crf_denom_kernel,
        out_shape=jax.ShapeDtypeStruct((nb, 1, TB), jnp.float32),
        grid=(nb, nt),
        in_specs=[
            pl.BlockSpec((t_chunk, K_sub, TB), lambda b, t: (t, 0, b)),  # emissions
            pl.BlockSpec((t_chunk, 1, TB), lambda b, t: (t, 0, b)),      # mask
            pl.BlockSpec((K_sub, TB), lambda b, t: (0, b)),              # p0
            pl.BlockSpec((1, TB), lambda b, t: (0, b)),                  # c0
            pl.BlockSpec((K_sub, K_sub), lambda b, t: (0, 0)),           # exp(trans^T)
            pl.BlockSpec((K_sub, 1), lambda b, t: (0, 0)),               # exp(end)
        ],
        out_specs=pl.BlockSpec((None, 1, TB), lambda b, t: (b, 0, 0)),
        scratch_shapes=[pltpu.VMEM((K_sub, TB), jnp.float32),            # p carry
                        pltpu.VMEM((1, TB), jnp.float32)],               # c carry
        compiler_params=pltpu.CompilerParams(
            dimension_semantics=("parallel", "arbitrary"),
            vmem_limit_bytes=vmem_limit),
        cost_estimate=cost,
    )(em_p, mask_p, p0_p, c0_p, etrans_T, eend)

    denom_shifted = out.reshape(B_pad)[:B]
    lengths = jnp.sum(mask_f, axis=0)                          # (B,)
    # Fold the max-shifts back in: +max(end), +max(trans)*(len-1).
    return denom_shifted + end_max + c_t * (lengths - 1.0)


def crf_forward(emissions, tags, mask, start_transitions, end_transitions,
                transitions, reduction='sum', batch_first=False, t_chunk=None):
    """JAX/Pallas equivalent of torchcrf CRF.forward."""
    if reduction not in ('none', 'sum', 'mean', 'token_mean'):
        raise ValueError(f'invalid reduction: {reduction}')
    if batch_first:
        emissions = jnp.swapaxes(emissions, 0, 1)
        tags = jnp.swapaxes(tags, 0, 1)
        if mask is not None:
            mask = jnp.swapaxes(mask, 0, 1)
    if mask is None:
        mask = jnp.ones(tags.shape, jnp.uint8)

    emissions = emissions.astype(jnp.float32)
    tags = tags.astype(jnp.int32)
    mask_f = mask.astype(jnp.float32)
    start_t = start_transitions.astype(jnp.float32)
    end_t = end_transitions.astype(jnp.float32)
    trans = transitions.astype(jnp.float32)

    numerator = _crf_numerator(emissions, tags, mask_f, start_t, end_t, trans)
    denominator = _crf_denominator(emissions, mask_f, start_t, end_t, trans,
                                   t_chunk=t_chunk)
    llh = numerator - denominator

    if reduction == 'none':
        return llh
    if reduction == 'sum':
        return jnp.sum(llh)
    if reduction == 'mean':
        return jnp.mean(llh)
    # token_mean
    # TODO(synk): torchcrf's token_mean also returns the per-step max-score
    # tensors ("sumed_scores"); only the scalar llh term is returned here.
    return jnp.sum(llh) / jnp.sum(mask_f)


# ------------------- pure-JAX reference (for checking) -----------------------
def crf_forward_ref(emissions, tags, mask, start_t, end_t, trans):
    T, B, K = emissions.shape
    maskf = mask.astype(jnp.float32)
    tags = tags.astype(jnp.int32)
    emissions = emissions.astype(jnp.float32)
    # numerator
    score = start_t[tags[0]] + emissions[0, jnp.arange(B), tags[0]]
    for i in range(1, T):
        score = score + trans[tags[i - 1], tags[i]] * maskf[i]
        score = score + emissions[i, jnp.arange(B), tags[i]] * maskf[i]
    seq_ends = jnp.sum(maskf, axis=0).astype(jnp.int32) - 1
    last_tags = tags[seq_ends, jnp.arange(B)]
    score = score + end_t[last_tags]
    # denominator
    alpha = start_t[None, :] + emissions[0]
    for i in range(1, T):
        nxt = alpha[:, :, None] + trans[None, :, :] + emissions[i][:, None, :]
        lse = jax.scipy.special.logsumexp(nxt, axis=1)
        alpha = jnp.where(maskf[i][:, None] > 0, lse, alpha)
    alpha = alpha + end_t[None, :]
    denom = jax.scipy.special.logsumexp(alpha, axis=1)
    return score - denom


if __name__ == "__main__":
    def make_case(key, num_tags, T, B, lengths):
        k1, k2, k3, k4, k5 = jax.random.split(key, 5)
        start_t = jax.random.uniform(k1, (num_tags,), jnp.float32, -0.1, 0.1)
        end_t = jax.random.uniform(k2, (num_tags,), jnp.float32, -0.1, 0.1)
        trans = jax.random.uniform(k3, (num_tags, num_tags), jnp.float32, -0.1, 0.1)
        emissions = jax.random.normal(k4, (T, B, num_tags), jnp.float32)
        tags = jax.random.randint(k5, (T, B), 0, num_tags, jnp.int32)
        lengths = jnp.asarray(lengths, jnp.int32)
        mask = (jnp.arange(T)[:, None] < lengths[None, :]).astype(jnp.uint8)
        return emissions, tags, mask, start_t, end_t, trans

    key = jax.random.PRNGKey(0)
    k_a, k_b = jax.random.split(key)

    # Case 1: the module's small example (T=8, B=2, K=8), one padded sequence.
    em, tg, mk, st, en, tr = make_case(k_a, 8, 8, 2, [8, 5])
    llh_none = crf_forward(em, tg, mk, st, en, tr, reduction='none')
    llh_sum = crf_forward(em, tg, mk, st, en, tr, reduction='sum')
    jax.block_until_ready(llh_none)
    jax.block_until_ready(llh_sum)
    ref = crf_forward_ref(em, tg, mk, st, en, tr)
    assert jnp.allclose(llh_none, ref, atol=1e-3, rtol=1e-4), (llh_none, ref)
    assert jnp.allclose(llh_sum, jnp.sum(ref), atol=1e-3, rtol=1e-4)

    # Case 2: exercises K/T/B padding, multi-chunk scratch carry (nt > 1)
    # and a length-1 sequence.
    em2, tg2, mk2, st2, en2, tr2 = make_case(k_b, 5, 20, 3, [20, 13, 1])
    llh2 = crf_forward(em2, tg2, mk2, st2, en2, tr2, reduction='none', t_chunk=8)
    jax.block_until_ready(llh2)
    ref2 = crf_forward_ref(em2, tg2, mk2, st2, en2, tr2)
    assert jnp.allclose(llh2, ref2, atol=1e-3, rtol=1e-4), (llh2, ref2)

    print("KERNEL_OK")
</pallas_src>

<mosaic_0001>
module attributes {stable_mosaic.version = 11 : i64} {
  func.func @_crf_denom_kernel(%arg0: i32, %arg1: i32, %arg2: memref<8x8x128xf32, #tpu.memory_space<vmem>>, %arg3: memref<8x1x128xf32, #tpu.memory_space<vmem>>, %arg4: memref<8x128xf32, #tpu.memory_space<vmem>>, %arg5: memref<1x128xf32, #tpu.memory_space<vmem>>, %arg6: memref<8x8xf32, #tpu.memory_space<vmem>>, %arg7: memref<8x1xf32, #tpu.memory_space<vmem>>, %arg8: memref<1x1x128xf32, #tpu.memory_space<vmem>>, %arg9: memref<8x128xf32, #tpu.memory_space<vmem>>, %arg10: memref<1x128xf32, #tpu.memory_space<vmem>>) attributes {dimension_semantics = [#tpu.dimension_semantics<parallel>, #tpu.dimension_semantics<arbitrary>], iteration_bounds = array<i64: 1, 1>, scalar_prefetch = 0 : i64, scratch_operands = 2 : i64, tpu.core_type = #tpu.core_type<tc>, window_params = [{transform_indices = @transform_0, window_bounds = array<i64: 8, 8, 128>}, {transform_indices = @transform_1, window_bounds = array<i64: 8, 1, 128>}, {transform_indices = @transform_2, window_bounds = array<i64: 8, 128>}, {transform_indices = @transform_3, window_bounds = array<i64: 1, 128>}, {pipeline_mode = #tpu.pipeline_mode<synchronous>, transform_indices = @transform_4, window_bounds = array<i64: 8, 8>}, {pipeline_mode = #tpu.pipeline_mode<synchronous>, transform_indices = @transform_5, window_bounds = array<i64: 8, 1>}, {transform_indices = @transform_6, window_bounds = array<i64: 1, 1, 128>}]} {
    %c0_i32 = arith.constant 0 : i32
    %0 = arith.cmpi eq, %arg1, %c0_i32 : i32
    %1 = arith.extui %0 : i1 to i32
    %c0_i32_0 = arith.constant 0 : i32
    %2 = arith.cmpi ne, %1, %c0_i32_0 : i32
    scf.if %2 {
      %c0_15 = arith.constant 0 : index
      %c0_16 = arith.constant 0 : index
      %13 = vector.load %arg4[%c0_15, %c0_16] : memref<8x128xf32, #tpu.memory_space<vmem>>, vector<8x128xf32>
      %c0_17 = arith.constant 0 : index
      %c0_18 = arith.constant 0 : index
      %14 = vector.load %arg9[%c0_17, %c0_18] : memref<8x128xf32, #tpu.memory_space<vmem>>, vector<8x128xf32>
      tpu.vector_store %arg9[%c0_17, %c0_18], %13 {strides = array<i32>} : memref<8x128xf32, #tpu.memory_space<vmem>>, vector<8x128xf32>,
      %c0_19 = arith.constant 0 : index
      %c0_20 = arith.constant 0 : index
      %15 = vector.load %arg5[%c0_19, %c0_20] : memref<1x128xf32, #tpu.memory_space<vmem>>, vector<1x128xf32>
      %c0_21 = arith.constant 0 : index
      %c0_22 = arith.constant 0 : index
      %16 = vector.load %arg10[%c0_21, %c0_22] : memref<1x128xf32, #tpu.memory_space<vmem>>, vector<1x128xf32>
      tpu.vector_store %arg10[%c0_21, %c0_22], %15 {strides = array<i32>} : memref<1x128xf32, #tpu.memory_space<vmem>>, vector<1x128xf32>,
    } else {
    }
    %c0 = arith.constant 0 : index
    %c0_1 = arith.constant 0 : index
    %3 = vector.load %arg6[%c0, %c0_1] : memref<8x8xf32, #tpu.memory_space<vmem>>, vector<8x8xf32>
    %c0_2 = arith.constant 0 : index
    %c0_3 = arith.constant 0 : index
    %4 = vector.load %arg9[%c0_2, %c0_3] : memref<8x128xf32, #tpu.memory_space<vmem>>, vector<8x128xf32>
    %c0_4 = arith.constant 0 : index
    %c0_5 = arith.constant 0 : index
    %5 = vector.load %arg10[%c0_4, %c0_5] : memref<1x128xf32, #tpu.memory_space<vmem>>, vector<1x128xf32>
    %cst = arith.constant 1.000000e-30 : f32
    %c0_i32_6 = arith.constant 0 : i32
    %c8_i32 = arith.constant 8 : i32
    %6 = arith.addi %c0_i32_6, %c8_i32 : i32
    %c1_i32 = arith.constant 1 : i32
    %7:2 = scf.for %arg11 = %c0_i32_6 to %6 step %c1_i32 iter_args(%arg12 = %4, %arg13 = %5) -> (vector<8x128xf32>, vector<1x128xf32>)  : i32 {
      %13 = arith.index_cast %arg11 : i32 to index
      %c0_15 = arith.constant 0 : index
      %c0_16 = arith.constant 0 : index
      %14 = vector.load %arg2[%13, %c0_15, %c0_16] : memref<8x8x128xf32, #tpu.memory_space<vmem>>, vector<1x8x128xf32>
      %15 = vector.shape_cast %14 : vector<1x8x128xf32> to vector<8x128xf32>
      %16 = arith.index_cast %arg11 : i32 to index
      %c0_17 = arith.constant 0 : index
      %c0_18 = arith.constant 0 : index
      %17 = vector.load %arg3[%16, %c0_17, %c0_18] : memref<8x1x128xf32, #tpu.memory_space<vmem>>, vector<1x1x128xf32>
      %18 = vector.shape_cast %17 : vector<1x1x128xf32> to vector<1x128xf32>
      %cst_19 = arith.constant 0.000000e+00 : f32
      %19 = vector.broadcast %cst_19 : f32 to vector<1x128xf32>
      %20 = arith.cmpf ogt, %18, %19 : vector<1x128xf32>
      %cst_20 = arith.constant dense<0xFF800000> : vector<128xf32>
      %21 = vector.multi_reduction <maximumf>, %15, %cst_20 [0] : vector<8x128xf32> to vector<128xf32>
      %22 = vector.shape_cast %21 : vector<128xf32> to vector<1x128xf32>
      %23 = vector.broadcast %22 : vector<1x128xf32> to vector<8x128xf32>
      %24 = arith.subf %15, %23 : vector<8x128xf32>
      %25 = math.exp %24 : vector<8x128xf32>
      %cst_21 = arith.constant dense<0.000000e+00> : vector<8x128xf32>
      %26 = tpu.matmul %3, %arg12, %cst_21 {dimension_numbers = #tpu.dot_dimension_numbers<[1], [0], [0], [1], [0, 0, 1, 1], [], []>} : vector<8x8xf32>, vector<8x128xf32>, vector<8x128xf32> -> vector<8x128xf32>
      %27 = arith.mulf %26, %25 : vector<8x128xf32>
      %cst_22 = arith.constant dense<0.000000e+00> : vector<128xf32>
      %28 = vector.multi_reduction <add>, %27, %cst_22 [0] : vector<8x128xf32> to vector<128xf32>
      %29 = vector.shape_cast %28 : vector<128xf32> to vector<1x128xf32>
      %30 = vector.broadcast %cst : f32 to vector<1x128xf32>
      %31 = arith.maximumf %29, %30 : vector<1x128xf32>
      %cst_23 = arith.constant 1.000000e+00 : f32
      %32 = vector.broadcast %cst_23 : f32 to vector<1x128xf32>
      %33 = arith.divf %32, %31 : vector<1x128xf32>
      %34 = vector.broadcast %33 : vector<1x128xf32> to vector<8x128xf32>
      %35 = arith.mulf %27, %34 : vector<8x128xf32>
      %36 = math.log %31 : vector<1x128xf32>
      %37 = arith.addf %arg13, %36 : vector<1x128xf32>
      %38 = arith.addf %37, %22 : vector<1x128xf32>
      %39 = vector.shape_cast %20 : vector<1x128xi1> to vector<1x128xi1>
      %40 = vector.broadcast %39 : vector<1x128xi1> to vector<8x128xi1>
      %41 = arith.select %40, %35, %arg12 : vector<8x128xi1>, vector<8x128xf32>
      %42 = arith.select %20, %38, %arg13 : vector<1x128xi1>, vector<1x128xf32>
      scf.yield %41, %42 : vector<8x128xf32>, vector<1x128xf32>
    }
    %c8_i32_7 = arith.constant 8 : i32
    %c0_8 = arith.constant 0 : index
    %c0_9 = arith.constant 0 : index
    %8 = vector.load %arg9[%c0_8, %c0_9] : memref<8x128xf32, #tpu.memory_space<vmem>>, vector<8x128xf32>
    tpu.vector_store %arg9[%c0_8, %c0_9], %7#0 {strides = array<i32>} : memref<8x128xf32, #tpu.memory_space<vmem>>, vector<8x128xf32>,
    %c0_10 = arith.constant 0 : index
    %c0_11 = arith.constant 0 : index
    %9 = vector.load %arg10[%c0_10, %c0_11] : memref<1x128xf32, #tpu.memory_space<vmem>>, vector<1x128xf32>
    tpu.vector_store %arg10[%c0_10, %c0_11], %7#1 {strides = array<i32>} : memref<1x128xf32, #tpu.memory_space<vmem>>, vector<1x128xf32>,
    %c0_i32_12 = arith.constant 0 : i32
    %10 = arith.cmpi eq, %arg1, %c0_i32_12 : i32
    %11 = arith.extui %10 : i1 to i32
    %cst_13 = arith.constant 1.000000e-30 : f32
    %c0_i32_14 = arith.constant 0 : i32
    %12 = arith.cmpi ne, %11, %c0_i32_14 : i32
    scf.if %12 {
      %c0_15 = arith.constant 0 : index
      %c0_16 = arith.constant 0 : index
      %13 = vector.load %arg7[%c0_15, %c0_16] : memref<8x1xf32, #tpu.memory_space<vmem>>, vector<8x1xf32>
      %14 = vector.broadcast %13 : vector<8x1xf32> to vector<8x128xf32>
      %15 = arith.mulf %7#0, %14 : vector<8x128xf32>
      %cst_17 = arith.constant dense<0.000000e+00> : vector<128xf32>
      %16 = vector.multi_reduction <add>, %15, %cst_17 [0] : vector<8x128xf32> to vector<128xf32>
      %17 = vector.shape_cast %16 : vector<128xf32> to vector<1x128xf32>
      %18 = vector.broadcast %cst_13 : f32 to vector<1x128xf32>
      %19 = arith.maximumf %17, %18 : vector<1x128xf32>
      %20 = math.log %19 : vector<1x128xf32>
      %21 = arith.addf %7#1, %20 : vector<1x128xf32>
      %c0_18 = arith.constant 0 : index
      %c0_19 = arith.constant 0 : index
      %c0_20 = arith.constant 0 : index
      %22 = vector.load %arg8[%c0_18, %c0_19, %c0_20] : memref<1x1x128xf32, #tpu.memory_space<vmem>>, vector<1x1x128xf32>
      %23 = vector.shape_cast %22 : vector<1x1x128xf32> to vector<1x128xf32>
      %24 = vector.shape_cast %21 : vector<1x128xf32> to vector<1x1x128xf32>
      tpu.vector_store %arg8[%c0_18, %c0_19, %c0_20], %24 {strides = array<i32>} : memref<1x1x128xf32, #tpu.memory_space<vmem>>, vector<1x1x128xf32>,
    } else {
    }
    return
  }
  func.func @transform_0(%arg0: i32, %arg1: i32) -> (i32, i32, i32) {
    %c0_i32 = arith.constant 0 : i32
    %c0_i32_0 = arith.constant 0 : i32
    return %arg1, %c0_i32, %arg0 : i32, i32, i32
  }
  func.func @transform_1(%arg0: i32, %arg1: i32) -> (i32, i32, i32) {
    %c0_i32 = arith.constant 0 : i32
    %c0_i32_0 = arith.constant 0 : i32
    return %arg1, %c0_i32, %arg0 : i32, i32, i32
  }
  func.func @transform_2(%arg0: i32, %arg1: i32) -> (i32, i32) {
    %c0_i32 = arith.constant 0 : i32
    %c0_i32_0 = arith.constant 0 : i32
    return %c0_i32, %arg0 : i32, i32
  }
  func.func @transform_3(%arg0: i32, %arg1: i32) -> (i32, i32) {
    %c0_i32 = arith.constant 0 : i32
    %c0_i32_0 = arith.constant 0 : i32
    return %c0_i32, %arg0 : i32, i32
  }
  func.func @transform_4(%arg0: i32, %arg1: i32) -> (i32, i32) {
    %c0_i32 = arith.constant 0 : i32
    %c0_i32_0 = arith.constant 0 : i32
    %c0_i32_1 = arith.constant 0 : i32
    return %c0_i32, %c0_i32_0 : i32, i32
  }
  func.func @transform_5(%arg0: i32, %arg1: i32) -> (i32, i32) {
    %c0_i32 = arith.constant 0 : i32
    %c0_i32_0 = arith.constant 0 : i32
    %c0_i32_1 = arith.constant 0 : i32
    return %c0_i32, %c0_i32_0 : i32, i32
  }
  func.func @transform_6(%arg0: i32, %arg1: i32) -> (i32, i32, i32) {
    %c0_i32 = arith.constant 0 : i32
    %c0_i32_0 = arith.constant 0 : i32
    %c0_i32_1 = arith.constant 0 : i32
    return %arg0, %c0_i32, %c0_i32_0 : i32, i32, i32
  }
}

</mosaic_0001>

<bundles_post_ra>
// kernel: tpu_custom_call.1
= control target key start
LH: loop header
LB: loop body
LE: loop exit
PB: predicated region body
PF: predicated region fallthrough
CT: control target
= control target key end

     0   :  { %11 = vsyncpa [#allocation5], 0  ;;  %s491_s0 = inlined_call_operand.hbm [shape: f32[8,8,128], index: 0, kind: input, shape index: {}]   ;;  %s492_s1 = inlined_call_operand.vmem [shape: f32[8,1,128], index: 1, kind: input, shape index: {}]   ;;  %s493_s2 = inlined_call_operand.vmem [shape: f32[8,128], index: 2, kind: input, shape index: {}]   ;;  %s494_s3 = inlined_call_operand.hbm [shape: f32[1,128], index: 3, kind: input, shape index: {}]   ;;  %s495_s4 = inlined_call_operand.vmem [shape: f32[8,8], index: 4, kind: input, shape index: {}]   ;;  %s496_s5 = inlined_call_operand.vmem [shape: f32[8,1], index: 5, kind: input, shape index: {}]   ;;  %s497_s6 = inlined_call_operand.hbm [shape: f32[1,1,128], index: 6, kind: output, shape index: {}]  }
   0x1   :  { %12 = vsyncpa [#allocation8], 0 }
   0x2   :  { %13 = vsyncpa [#allocation6], 0  ;;  %s381_s21 = smov [#allocation4]   ;;  %s285_s25 = scalar_lea.hbm %s491_s0, 1024 }
   0x3   :  { %s19_s22 = sshll.u32 %s381_s21, 4  ;;  %p286_p0 = scmp.ne.s32.totalorder %s491_s0, %s285_s25  ;;  %s20_s22 = int_to_ptr.vmem [resolvable:$true] %s19_s22 }
   0x4   :  { %p289_p1 = scmp.lt.u32.totalorder %s285_s25, %s491_s0 }
   0x6   :  { %p291_p2 = pnand %p289_p1, %p286_p0 }
   0x8   :  { %294 = shalt.err (!%p291_p2)
}
   0x9   :  { %s295_s30 = scalar_lea.vmem %s20_s22, 1024  ;;  %p300_p4 = scmp.lt.s32.totalorder %s20_s22, %s20_s22 }
   0xa   :  { %p296_p3 = scmp.ne.s32.totalorder %s20_s22, %s295_s30  ;;  %p301_p5 = scmp.lt.s32.totalorder %s295_s30, %s295_s30 }
   0xc   :  { %p302_p6 = por %p301_p5, %p300_p4 }
   0xe   :  { %p303_p7 = pnand %p302_p6, %p296_p3 }
  0x10   :  { %306 = shalt.err (!%p303_p7)
}
  0x11   :  { %s382_s7 = smov 128   ;;  %s383_s8 = smov 8  }
  0x12   :  { %25 = dma.hbm_to_vmem [thread:$0]  %s491_s0, 1024, %s20_s22, [#allocation5], %s382_s7, %s382_s7, %s383_s8  }
  0x13   :  { %s384_s11 = smov [#allocation7]   ;;  %s307_s15 = scalar_lea.hbm %s494_s3, 16 }
  0x14   :  { %s36_s12 = sshll.u32 %s384_s11, 4  ;;  %p308_p8 = scmp.ne.s32.totalorder %s494_s3, %s307_s15  ;;  %s37_s12 = int_to_ptr.vmem [resolvable:$true] %s36_s12 }
  0x15   :  { %p311_p9 = scmp.lt.u32.totalorder %s307_s15, %s494_s3 }
  0x17   :  { %p313_p10 = pnand %p311_p9, %p308_p8 }
  0x19   :  { %316 = shalt.err (!%p313_p10)
}
  0x1a   :  { %s317_s20 = scalar_lea.vmem %s37_s12, 16  ;;  %s321_s0 = scalar_lea.vmem %s37_s12, 32 }
  0x1b   :  { %p318_p11 = scmp.ne.s32.totalorder %s37_s12, %s317_s20  ;;  %p322_p12 = scmp.lt.s32.totalorder %s37_s12, %s37_s12 }
  0x1c   :  { %p323_p13 = scmp.lt.s32.totalorder %s321_s0, %s317_s20 }
  0x1e   :  { %p324_p0 = por %p323_p13, %p322_p12 }
  0x20   :  { %p325_p1 = pnand %p324_p0, %p318_p11 }
  0x22   :  { %328 = shalt.err (!%p325_p1)
}
  0x23   :  { %39 = dma.hbm_to_vmem [thread:$0]  %s494_s3, 16, %s37_s12, [#allocation8]  }
  0x24   :  { %363 = dma.done.wait [#allocation5], 1024  }
  0x25   :  { %364 = vsyncadd [#allocation5], 4294966272 }
  0x26   :  { %365 = dma.done.wait [#allocation8], 16  }
  0x27   :  { %366 = vsyncadd [#allocation8], 4294967280  ;;  %v452_v0 = vld [vmem:[%s495_s4] sm:$0xff]  ;;  %s459_s3 = smov 0  }
  0x28   :  { %v54_v1 = vld [vmem:[%s493_s2] sm:$0xff]  }
  0x29   :  { %v56_v2 = vld [vmem:[#allocation7] sm:$0x1]  ;;  %v373_v4 = vmov %v54_v1  }
  0x2a   :  { %57 = vst [vmem:[#allocation3] sm:$0x1] %v56_v2 }
  0x31   :  { %v60_v3 = vld [vmem:[#allocation3] sm:$0x1]  }
  0x32 LB: > { %vm84_vm0 = vcmask 64512   ;;  %v385_v5 = vmov 0.0   ;;  %vm386_vm1 = vmmov 0   ;;  %s234_s2 = sshll.u32 %s379_s3, 3  ;;  %s72_s29 = scalar_lea.vmem %s492_s1, %s379_s3  ;;  %v174_v24 = vlaneseq  ;;  %s379_s3 = sphi %s459_s3, %s66_s3   ;;  %v375_v4 = vphi %v373_v4, %v374_v4   ;;  %v371_v3 = vphi %v60_v3, %v498_v3  }
  0x33   : > { %238 = vmatprep.subr.mxu0 %v385_v5  ;;  %240 = vmatprep.mubr.msk.f32.mxu0 %vm386_vm1, %v385_v5  ;;  %s70_s4 = scalar_lea.vmem [#allocation4], %s234_s2  ;;  %v73_v26 = vld [vmem:[%s72_s29] sm:$0x1]  ;;  %v387_v30 = vmov 0   ;;  %s66_s3 = sadd.s32 1, %s379_s3  }
  0x34   : > { %239 = vmatpush3.msra.mxu0 %v375_v4  ;;  %v71_v6 = vld [vmem:[%s70_s4] sm:$0xff]  ;;  %v175_v28 = vshrl.u32 %v174_v24, 7  ;;  %vm74_vm2 = vcmp.gt.f32.partialorder %v73_v26, 0.0  ;;  %p63_p2 = scmp.ge.s32.totalorder %s66_s3, 8  }
  0x35   : > { %241 = vmatmul.mubr.msk.f32.vlgmr.msra.gmra.mrb[0].mxu0 %vm84_vm0, %v452_v0  ;;  %v75_v7 = vrot.slane %v71_v6, 4  ;;  %v173_v31 = vsel %vm74_vm2, 1, %v387_v30  ;;  %v186_v41 = vld [vmem:[%s496_s5] sm:$0xff] (%p63_p2)  ;;  %v388_v42 = vmov (%p63_p2), 0   ;;  %s389_s8 = smov (%p63_p2), [#allocation9]  }
  0x36   : > { %v176_v29 = vsub.s32 0, %v175_v28  ;;  %282 = vset.pattern.permute.xlu0 (%p63_p2), %v388_v42  ;;  %s210_s1 = sshll.u32 (%p63_p2), %s389_s8, 4  ;;  %s211_s1 = int_to_ptr.vmem [resolvable:$true] %s210_s1 }
  0x37   : > { %v76_v8 = vmax.f32 %v71_v6, %v75_v7  ;;  %189 = vperm.xlu0 (%p63_p2), %282, %v186_v41   ;;  %s329_s5 = scalar_lea.vmem (%p63_p2), %s211_s1, 16  ;;  %s333_s9 = scalar_lea.vmem (%p63_p2), %s211_s1, 32 }
  0x38   : > { %v177_v32 = vrot.slane %v173_v31, %v176_v29  ;;  %p330_p3 = scmp.ne.s32.totalorder (%p63_p2), %s211_s1, %s329_s5  ;;  %p334_p4 = scmp.lt.s32.totalorder (%p63_p2), %s211_s1, %s211_s1 }
  0x39   : > { %v77_v9 = vrot.slane %v76_v8, 2  ;;  %p335_p5 = scmp.lt.s32.totalorder (%p63_p2), %s333_s9, %s329_s5 }
  0x3a   : > { %vm178_vm3 = vcmp.eq.s32.totalorder %v177_v32, 1 }
  0x3b   : > { %v78_v10 = vmax.f32 %v76_v8, %v77_v9  ;;  %p336_p6 = por (%p63_p2), %p335_p5, %p334_p4 }
  0x3d   : > { %v79_v11 = vrot.slane %v78_v10, 1  ;;  %p337_p7 = pnand (%p63_p2), %p336_p6, %p330_p3 }
  0x3f   : > { %v80_v12 = vmax.f32 %v78_v10, %v79_v11 }
  0x41   : > { %v81_v13 = vsub.f32 %v71_v6, %v80_v12 }
  0x43   : > { %v82_v14 = vmul.f32 1.442695, %v81_v13 }
  0x45   : > { %276 = vpow2.f32 %v82_v14 }
  0x4f   : > { %v277_v15 = vpop.eup %276 }
  0xb6   :  { %v190_v43 = vpop.permute.xlu0 (%p63_p2), %189 }
 0x108   : > { %v154_v16 = vpop.f32.mrb[0].mxu0 }
 0x109   : > { %v158_v17 = vmul.f32 %v277_v15, %v154_v16  ;;  %v242_v18 = vpop.f32.mrb[1].mxu0 }
 0x10b   : > { %v159_v19 = vrot.slane %v158_v17, 4 }
 0x10d   : > { %v160_v20 = vadd.f32 %v159_v19, %v158_v17 }
 0x10f   : > { %v161_v21 = vrot.slane %v160_v20, 2 }
 0x111   : > { %v162_v22 = vadd.f32 %v161_v21, %v160_v20 }
 0x113   : > { %v163_v23 = vrot.slane %v162_v22, 1 }
 0x115   : > { %v164_v25 = vadd.f32 %v163_v23, %v162_v22 }
 0x117   : > { %v165_v27 = vmax.f32 %v164_v25, 1e-30 }
 0x119   : > { %278 = vrcp.f32 %v165_v27 }
 0x11a   : > { %280 = vlog2.f32 %v165_v27 }
 0x123   : > { %v279_v33 = vpop.eup %278 }
 0x124   : > { %v281_v34 = vpop.eup %280  ;;  %v168_v35 = vmul.f32 %v279_v33, %v158_v17 }
 0x125   : > { %v170_v36 = vmul.f32 0.6931472, %v281_v34 }
 0x126   : > { %v179_v37 = vsel %vm178_vm3, %v168_v35, %v375_v4   ;;  %65 = sbr.rel (!%p63_p2) target bundleno = 50 (0x32), region = 69 }
 0x127   : > { %v171_v38 = vadd.f32 %v371_v3, %v170_v36  ;;  %v374_v4 = vmov %v179_v37   ;;  %v192_v44 = vmul.f32 (%p63_p2), %v190_v43, %v179_v37 }
 0x129   : > { %v172_v39 = vadd.f32 %v171_v38, %v80_v12  ;;  %v193_v45 = vrot.slane (%p63_p2), %v192_v44, 4 }
 0x12b   : > { %v180_v40 = vsel %vm74_vm2, %v172_v39, %v371_v3   ;;  %v194_v46 = vadd.f32 (%p63_p2), %v193_v45, %v192_v44 }
 0x12c   : > { %v498_v3 = vmov %v180_v40  ;;  %182 = vst [vmem:[#allocation3] sm:$0x1] (%p63_p2), %v180_v40 }
 0x12d   :  { %v195_v47 = vrot.slane %v194_v46, 2 }
 0x12f   :  { %v196_v48 = vadd.f32 %v195_v47, %v194_v46 }
 0x131   :  { %v197_v49 = vrot.slane %v196_v48, 1 }
 0x133   :  { %v198_v50 = vadd.f32 %v197_v49, %v196_v48 }
 0x135   :  { %v199_v51 = vmax.f32 %v198_v50, 1e-30 }
 0x137   :  { %283 = vlog2.f32 %v199_v51 }
 0x141   :  { %v284_v52 = vpop.eup %283 }
 0x142   :  { %v201_v53 = vmul.f32 0.6931472, %v284_v52 }
 0x144   :  { %v202_v54 = vadd.f32 %v201_v53, %v180_v40 }
 0x146   :  { %203 = vst [vmem:[#allocation9] sm:$0x1] %v202_v54 }
 0x147   :  { %340 = shalt.err (!%p337_p7)
}
 0x148   :  { %s341_s12 = scalar_lea.hbm %s497_s6, 16 }
 0x149   :  { %p342_p8 = scmp.ne.s32.totalorder %s497_s6, %s341_s12  ;;  %p345_p9 = scmp.lt.u32.totalorder %s341_s12, %s497_s6 }
 0x14b   :  { %p347_p10 = pnand %p345_p9, %p342_p8 }
 0x14d   :  { %350 = shalt.err (!%p347_p10)
}
 0x14e   :  { %213 = dma.vmem_to_hbm [thread:$0]  %s211_s1, 16, %s497_s6, [#allocation6]  }
 0x14f   :  { %367 = dma.done.wait [#allocation6], 16  }
 0x150   :  { %368 = vsyncadd [#allocation6], 4294967280 }
 0x151   :  { %217 = vsyncpa [#allocation5], 1 }
 0x152   :  { %218 = vsyncpa [#allocation8], 1 }
 0x153   :  { %219 = vsyncpa [#allocation6], 1 }

</bundles_post_ra>
